<compile_context>
chip_gen: v7x
topology: tpu7x:2x2x1
jax: 0.10.0
libtpu: 0.0.40
codegen_flags: <defaults>
</compile_context>

<pallas_src>
import functools
import math

import jax
import jax.numpy as jnp
from jax import lax
from jax.experimental import pallas as pl
from jax.experimental.pallas import tpu as pltpu


def _round_up(x: int, m: int) -> int:
    return ((x + m - 1) // m) * m


def _round_down(x: int, m: int) -> int:
    return (x // m) * m


# Sublane packing factor per element byte-width (rows per 32-bit sublane slot).
_SUBLANE_PACK = {1: 32, 2: 16, 4: 8, 8: 8}


def _rmsnorm_pre_kernel(x_ref, o_ref, *, eps: float):
    # x_ref/o_ref: (tm, D) row tile; normalization is along the lane axis.
    x_native = x_ref[...]
    xf = x_native.astype(jnp.float32)            # reduction always in f32
    ms = jnp.mean(xf * xf, axis=-1, keepdims=True)
    inv_scale = lax.rsqrt(ms + eps)              # EUP rsqrt, VALU has slack
    if o_ref.dtype in (jnp.float32, jnp.float64):
        # Bit-exact vs. the f32 reference path.
        o_ref[...] = (xf * inv_scale).astype(o_ref.dtype)
    else:
        # bf16/fp8 inputs: multiply in the native dtype; drops one full-tile
        # f32 temporary (<=1 ulp rounding difference vs. f32 divide).
        o_ref[...] = x_native * inv_scale.astype(o_ref.dtype)


def rmsnorm_pre(x, *, eps: float = 1e-5, target_tile_bytes: int = 8 << 20):
    """x: [..., d_model]. Returns x / sqrt(mean(x^2, -1) + eps), same shape/dtype."""
    orig_shape = x.shape
    d_model = int(orig_shape[-1])
    M = int(math.prod(orig_shape[:-1]))
    itemsize = jnp.dtype(x.dtype).itemsize
    pack = _SUBLANE_PACK.get(itemsize, 8)

    # ---- VMEM budget from the actual hardware (64 MiB/core on v7x). ----
    try:
        hw_vmem = int(pltpu.get_tpu_info().vmem_capacity_bytes)
    except Exception:
        hw_vmem = 64 << 20  # conservative fallback
    vmem_cap = (hw_vmem * 3) // 4          # ~96 MiB v5e/v6e, ~48 MiB v7x

    # Per-row VMEM working set: 2x double-buffered input + 2x output tiles in
    # the I/O dtype, plus ~2 f32 temporaries worth of in-kernel intermediates.
    per_row_working = d_model * (4 * itemsize + 8)

    # Tile sizing: big enough for full-size DMAs (~8 MiB input tiles), small
    # enough to fit the VMEM budget, never bigger than the (packed) row count.
    tm_vmem_max = max(pack, _round_down((vmem_cap - (4 << 20)) // per_row_working, pack))
    tm_dma = max(pack, _round_down(target_tile_bytes // (d_model * itemsize), pack))
    tm = min(tm_dma, tm_vmem_max, _round_up(M, pack))
    tm = max(pack, _round_down(tm, pack))

    # Ensure >= 2 grid blocks when possible so both v7x TensorCores get work.
    if pl.cdiv(M, tm) < 2 and M > pack:
        tm = max(pack, _round_up(pl.cdiv(M, 2), pack))

    grid_m = pl.cdiv(M, tm)  # last block may be partial; OOB writes are dropped

    working_set = tm * per_row_working
    vmem_limit = min(max(working_set + (4 << 20), 32 << 20), vmem_cap)

    # Note: when d_model is a multiple of 128 (the usual transformer case) the
    # output stores are fully lane-dense unmasked vst; tiny d_model (like the
    # test case) legally uses the full-dim block and masked stores.
    x2d = x.reshape(M, d_model)
    kernel = functools.partial(_rmsnorm_pre_kernel, eps=eps)

    out2d = pl.pallas_call(
        kernel,
        out_shape=jax.ShapeDtypeStruct((M, d_model), x.dtype),
        grid_spec=pltpu.PrefetchScalarGridSpec(
            num_scalar_prefetch=0,
            grid=(grid_m,),
            in_specs=[pl.BlockSpec((tm, d_model), lambda i: (i, 0))],
            out_specs=pl.BlockSpec((tm, d_model), lambda i: (i, 0)),
        ),
        compiler_params=pltpu.CompilerParams(
            dimension_semantics=("parallel",),
            vmem_limit_bytes=vmem_limit,
        ),
        cost_estimate=pl.CostEstimate(
            flops=3 * M * d_model,               # square + reduce-add + scale-mul
            transcendentals=M,                   # one rsqrt per row
            bytes_accessed=2 * M * d_model * itemsize,
        ),
    )(x2d)

    return out2d.reshape(orig_shape)


def _reference(x, eps):
    xf = x.astype(jnp.float32)
    scale = jnp.sqrt(jnp.mean(xf * xf, axis=-1, keepdims=True) + eps)
    return (xf / scale).astype(x.dtype)


if __name__ == "__main__":
    eps = 1e-5
    key = jax.random.PRNGKey(0)

    # Primary small test (batch=2, pos=8, d_model=32), f32.
    x = jax.random.normal(key, (2, 8, 32), dtype=jnp.float32)
    out = rmsnorm_pre(x, eps=eps)
    jax.block_until_ready(out)
    ref = _reference(x, eps)
    assert out.shape == x.shape
    assert out.dtype == x.dtype
    assert jnp.allclose(out, ref, atol=1e-5, rtol=1e-5)

    # Ragged test: row count not a multiple of the tile -> exercises the
    # partial last block (no wrapper pad/slice copies).
    key2 = jax.random.PRNGKey(1)
    x2 = jax.random.normal(key2, (3, 7, 32), dtype=jnp.float32)
    out2 = rmsnorm_pre(x2, eps=eps)
    jax.block_until_ready(out2)
    ref2 = _reference(x2, eps)
    assert out2.shape == x2.shape
    assert jnp.allclose(out2, ref2, atol=1e-5, rtol=1e-5)

    print("KERNEL_OK")
</pallas_src>

<mosaic_0001>
module attributes {stable_mosaic.version = 11 : i64} {
  func.func @_rmsnorm_pre_kernel(%arg0: i32, %arg1: memref<8x32xf32, #tpu.memory_space<vmem>>, %arg2: memref<8x32xf32, #tpu.memory_space<vmem>>) attributes {dimension_semantics = [#tpu.dimension_semantics<parallel>], iteration_bounds = array<i64: 2>, scalar_prefetch = 0 : i64, scratch_operands = 0 : i64, tpu.core_type = #tpu.core_type<tc>, window_params = [{transform_indices = @transform_0, window_bounds = array<i64: 8, 32>}, {transform_indices = @transform_1, window_bounds = array<i64: 8, 32>}]} {
    %c0 = arith.constant 0 : index
    %c0_0 = arith.constant 0 : index
    %0 = vector.load %arg1[%c0, %c0_0] : memref<8x32xf32, #tpu.memory_space<vmem>>, vector<8x32xf32>
    %1 = arith.mulf %0, %0 : vector<8x32xf32>
    %cst = arith.constant dense<0.000000e+00> : vector<8xf32>
    %2 = vector.multi_reduction <add>, %1, %cst [1] : vector<8x32xf32> to vector<8xf32>
    %3 = vector.shape_cast %2 : vector<8xf32> to vector<8x1xf32>
    %cst_1 = arith.constant 3.200000e+01 : f32
    %4 = vector.broadcast %cst_1 : f32 to vector<8x1xf32>
    %5 = arith.divf %3, %4 : vector<8x1xf32>
    %cst_2 = arith.constant 9.99999974E-6 : f32
    %6 = vector.broadcast %cst_2 : f32 to vector<8x1xf32>
    %7 = arith.addf %5, %6 : vector<8x1xf32>
    %8 = math.rsqrt %7 : vector<8x1xf32>
    %9 = vector.broadcast %8 : vector<8x1xf32> to vector<8x32xf32>
    %10 = arith.mulf %0, %9 : vector<8x32xf32>
    %c0_3 = arith.constant 0 : index
    %c0_4 = arith.constant 0 : index
    %11 = vector.load %arg2[%c0_3, %c0_4] : memref<8x32xf32, #tpu.memory_space<vmem>>, vector<8x32xf32>
    tpu.vector_store %arg2[%c0_3, %c0_4], %10 {strides = array<i32>} : memref<8x32xf32, #tpu.memory_space<vmem>>, vector<8x32xf32>,
    return
  }
  func.func @transform_0(%arg0: i32) -> (i32, i32) {
    %c0_i32 = arith.constant 0 : i32
    %c0_i32_0 = arith.constant 0 : i32
    return %arg0, %c0_i32 : i32, i32
  }
  func.func @transform_1(%arg0: i32) -> (i32, i32) {
    %c0_i32 = arith.constant 0 : i32
    %c0_i32_0 = arith.constant 0 : i32
    return %arg0, %c0_i32 : i32, i32
  }
}

</mosaic_0001>

<bundles_post_ra>
// kernel: tpu_custom_call.1
= control target key start
LH: loop header
LB: loop body
LE: loop exit
PB: predicated region body
PF: predicated region fallthrough
CT: control target
= control target key end

     0   :  { %6 = vsyncpa [#allocation3], 0  ;;  %s559_s0 = inlined_call_operand.hbm [shape: f32[16,32], index: 0, kind: input, shape index: {}]   ;;  %s560_s1 = inlined_call_operand.hbm [shape: f32[16,32], index: 1, kind: output, shape index: {}]  }
   0x1   :  { %8 = vsyncpa [#allocation3 + $0x1], 0 }
   0x2   :  { %9 = vsyncpa [#allocation4], 0 }
   0x3   :  { %11 = vsyncpa [#allocation4 + $0x1], 0  ;;  %s398_s6 = smov 0   ;;  %s400_s7 = smov 0  }
   0x4   :  { %s402_s8 = smov 0   ;;  %s404_s9 = smov 0  }
   0x5 LB: > { %s419_s10 = sadd.s32 4294967295, %s384_s9   ;;  %s228_s11 = sadd.s32 4294967294, %s384_s9   ;;  %s384_s9 = sphi %s404_s9, %s575_s9   ;;  %s380_s8 = sphi %s402_s8, %s574_s8   ;;  %s376_s7 = sphi %s400_s7, %s573_s7   ;;  %s372_s6 = sphi %s398_s6, %s572_s6  }
   0x6   : > { %s423_s12 = sadd.s32 1, %s384_s9   ;;  %s24_s13 = sadd.s32 1, %s380_s8 }
   0x7   : > { %s21_s14 = ssub.s32 %s384_s9, %s423_s12  ;;  %p31_p0 = scmp.ne.s32.totalorder %s380_s8, %s376_s7 }
   0x8   : > { %p22_p1 = scmp.eq.s32.totalorder %s21_s14, 0  ;;  %p32_p2 = scmp.eq.s32.totalorder %s384_s9, 0 }
   0x9   : > { %p37_p3 = scmp.ne.s32.totalorder %s376_s7, %s372_s6  ;;  %p38_p4 = scmp.eq.s32.totalorder %s419_s10, 0 }
   0xa   : > { %s435_s15 = scalar_select %p22_p1, %s380_s8, %s24_s13  }
   0xb   : > { %p437_p5 = por %p32_p2, %p31_p0  ;;  %p441_p6 = por %p38_p4, %p37_p3 }
   0xc   : > { %p61_p7 = scmp.eq.s32.totalorder %s419_s10, 1  ;;  %p67_p8 = scmp.eq.s32.totalorder %s228_s11, 1 }
   0xd   : > { %p252_p10 = scmp.lt.s32.totalorder %s384_s9, 2  ;;  %s87_s20 = sand.u32 1, %s380_s8  }
   0xe   : > { %p448_p11 = por %p61_p7, %p31_p0  ;;  %p452_p12 = por %p67_p8, %p37_p3 }
   0xf   : > { %s232_s21 = sshll.u32 %s384_s9, 7  ;;  %s231_s22 = sshll.u32 %s87_s20, 3 }
  0x10   : > { %s564_s18 = scalar_select %p448_p11, 1, 0 }
  0x11   : > { %s565_s19 = scalar_select %p452_p12, 1, 0 }
  0x12   : > { %s461_s25 = scalar_lea.hbm %s559_s0, %s232_s21  ;;  %s91_s26 = scalar_lea.vmem [#allocation2], %s231_s22 }
  0x13   : > { %s98_s27 = sshll.u32 %s91_s26, 4  ;;  %p465_p13 = pnand %p252_p10, %p437_p5  ;;  %s469_s27 = int_to_ptr.vmem [resolvable:$true] %s98_s27 }
  0x14   : > { %s88_s29 = scalar_lea.sflag [#allocation3], %s87_s20  ;;  %s288_s30 = scalar_lea.hbm %s461_s25, 128 }
  0x15   : > { %p289_p2 = scmp.ne.s32.totalorder %s461_s25, %s288_s30  ;;  %p290_p3 = pneg %p465_p13 }
  0x16   : > { %s293_s4 = scalar_lea.hbm %s559_s0, 256  ;;  %p294_p5 = scmp.lt.u32.totalorder %s461_s25, %s559_s0 }
  0x17   : > { %p291_p4 = pnand %p290_p3, %p289_p2  ;;  %p295_p8 = scmp.lt.u32.totalorder %s293_s4, %s288_s30 }
  0x18   : > { %p297_p9 = scmp.lt.u32.totalorder %s288_s30, %s461_s25 }
  0x19   : > { %p292_p7 = pneg %p291_p4  ;;  %p296_p10 = por %p295_p8, %p294_p5 }
  0x1b   : > { %p298_p0 = por %p297_p9, %p296_p10 }
  0x1d   : > { %p299_p1 = pnand %p298_p0, %p292_p7 }
  0x1f   : > { %302 = shalt.err (!%p299_p1)
}
  0x20   : > { %s303_s13 = scalar_lea.vmem %s469_s27, 128  ;;  %s386_s14 = smov [#allocation2]  }
  0x21   : > { %p304_p2 = scmp.ne.s32.totalorder %s469_s27, %s303_s13  ;;  %s308_s16 = sshll.u32 %s386_s14, 4  ;;  %s309_s16 = int_to_ptr.vmem [resolvable:$false] %s308_s16 }
  0x22   : > { %s310_s20 = scalar_lea.vmem %s309_s16, 256  ;;  %p311_p11 = scmp.lt.s32.totalorder %s469_s27, %s309_s16 }
  0x23   : > { %p306_p4 = pnand %p304_p2, %p290_p3  ;;  %p312_p5 = scmp.lt.s32.totalorder %s310_s20, %s303_s13 }
  0x25   : > { %p307_p12 = pneg %p306_p4  ;;  %p313_p8 = por %p312_p5, %p311_p11 }
  0x27   : > { %p314_p9 = pnand %p313_p8, %p307_p12 }
  0x29   : > { %317 = shalt.err (!%p314_p9)
}
  0x2a   : > { %247 = dma.hbm_to_vmem [thread:$0]  (!%p465_p13), %s461_s25, 128, %s469_s27, %s88_s29  }
  0x2b   : > { %p567_p0 = scmp.lt.s32.totalorder %s384_s9, 3  ;;  %p568_p1 = scmp.ge.s32.totalorder %s384_s9, 1 }
  0x2d   : > { %p104_p3 = pnand %p568_p1, %p567_p0 }
  0x2e   : > { %s503_s21 = sand.u32 (!%p104_p3), 1, %s376_s7  }
  0x2f   : > { %107 = sbr.rel (%p104_p3) target bundleno = 232 (0xe8), region = 24  ;;  %s234_s22 = sshll.u32 (!%p104_p3), %s503_s21, 3 }
  0x30   : > { %s110_s23 = scalar_lea.sflag (!%p104_p3), [#allocation3], %s503_s21  ;;  %s113_s24 = scalar_lea.vmem (!%p104_p3), [#allocation2], %s234_s22 }
  0x36   : > { %363 = dma.done.wait (%p441_p6), %s110_s23, 128  }
  0x37   : > { %365 = vsyncadd (%p441_p6), %s110_s23, 4294967168  ;;  %v132_v0 = vld [vmem:[%s113_s24] sm:$0xff]  ;;  %vm134_vm0 = vcmask 261120   ;;  %s237_s25 = sshll.u32 %s419_s10, 7  ;;  %s131_s26 = scalar_lea.vmem [#allocation5], %s234_s22 }
  0x38   : > { %v133_v1 = vmul.f32 %v132_v0, %v132_v0  ;;  %s158_s27 = sshll.u32 %s131_s26, 4  ;;  %s515_s29 = scalar_lea.hbm %s560_s1, %s237_s25  ;;  %s517_s27 = int_to_ptr.vmem [resolvable:$true] %s158_s27 }
  0x39   : > { %s145_s30 = scalar_lea.sflag [#allocation4], %s503_s21  ;;  %s318_s2 = scalar_lea.vmem %s517_s27, 128 }
  0x3a   : > { %v135_v2 = vsel %vm134_vm0, %v133_v1, 0.0  ;;  %p319_p6 = scmp.ne.s32.totalorder %s517_s27, %s318_s2  ;;  %p569_p11 = scmp.ne.s32.totalorder %s564_s18, 0 }
  0x3b   : > { %136 = vadd.xlane.f32.xlu0 %v135_v2  ;;  %s387_s10 = smov [#allocation5]  }
  0x3c   : > { %p320_p12 = pnand %p319_p6, %p569_p11  ;;  %s322_s3 = sshll.u32 %s387_s10, 4  ;;  %s323_s3 = int_to_ptr.vmem [resolvable:$false] %s322_s3 }
  0x3d   : > { %s324_s4 = scalar_lea.vmem %s323_s3, 256  ;;  %p325_p7 = scmp.lt.s32.totalorder %s517_s27, %s323_s3 }
  0x3e   : > { %p321_p13 = pneg %p320_p12  ;;  %p326_p10 = scmp.lt.s32.totalorder %s324_s4, %s318_s2 }
  0x40   : > { %p327_p2 = por %p326_p10, %p325_p7 }
  0x42   : > { %p328_p4 = pnand %p327_p2, %p321_p13 }
  0xc8   : > { %v137_v3 = vpop.xlane.xlu0 %136 }
  0xc9   : > { %v139_v4 = vmul.f32 0.03125, %v137_v3 }
  0xcb   : > { %v140_v5 = vadd.f32 1e-05, %v139_v4 }
  0xcd   : > { %286 = vrsqrt.f32 %v140_v5 }
  0xd7   : > { %v287_v6 = vpop.eup %286 }
  0xd8   : > { %v142_v7 = vmul.f32 %v287_v6, %v132_v0 }
  0xda   : > { %143 = vst.msk [vmem:[%s131_s26] sm:$0xff] %vm134_vm0, %v142_v7 }
  0xdb   : > { %331 = shalt.err (!%p328_p4)
}
  0xdc   : > { %s332_s5 = scalar_lea.hbm %s515_s29, 128  ;;  %s336_s14 = scalar_lea.hbm %s560_s1, 256 }
  0xdd   : > { %p333_p5 = scmp.ne.s32.totalorder %s515_s29, %s332_s5  ;;  %p337_p0 = scmp.lt.u32.totalorder %s515_s29, %s560_s1 }
  0xde   : > { %p338_p1 = scmp.lt.u32.totalorder %s336_s14, %s332_s5  ;;  %p340_p6 = scmp.lt.u32.totalorder %s332_s5, %s515_s29 }
  0xdf   : > { %p334_p8 = pnand %p333_p5, %p569_p11 }
  0xe0   : > { %p339_p3 = por %p338_p1, %p337_p0 }
  0xe1   : > { %p335_p9 = pneg %p334_p8 }
  0xe2   : > { %p341_p12 = por %p340_p6, %p339_p3 }
  0xe4   : > { %p342_p13 = pnand %p341_p12, %p335_p9 }
  0xe6   : > { %345 = shalt.err (!%p342_p13)
}
  0xe7   : > { %242 = dma.vmem_to_hbm [thread:$0]  (%p569_p11), %s517_s27, 128, %s515_s29, %s145_s30  }
  0xe8 PF: > { %s170_s21 = sand.u32 1, %s372_s6   ;;  %p570_p7 = scmp.ne.s32.totalorder %s565_s19, 0 }
  0xe9   : > { %p571_p10 = scmp.ge.s32.totalorder %s384_s9, 2  ;;  %s171_s22 = scalar_lea.sflag [#allocation4], %s170_s21 }
  0xeb   : > { %p249_p2 = pnand %p571_p10, %p570_p7 }
  0xed   : > { %367 = dma.done.wait (!%p249_p2), %s171_s22, 128  }
  0xee   : > { %369 = vsyncadd (!%p249_p2), %s171_s22, 4294967168  ;;  %p14_p4 = scmp.ge.s32.totalorder %s423_s12, 4   ;;  %s572_s6 = smov %s376_s7 }
  0xef   : > { %s573_s7 = smov %s380_s8  ;;  %s574_s8 = smov %s435_s15 }
  0xf0   : > { %s575_s9 = smov %s423_s12  ;;  %16 = sbr.rel (!%p14_p4) target bundleno = 5 (0x5), region = 69 }
  0xf7   :  { %176 = vsyncpa [#allocation3], 1 }
  0xf8   :  { %178 = vsyncpa [#allocation3 + $0x1], 1 }
  0xf9   :  { %179 = vsyncpa [#allocation4], 1 }
  0xfa   :  { %181 = vsyncpa [#allocation4 + $0x1], 1 }

</bundles_post_ra>
